<compile_context>
chip_gen: v6e
topology: v6e:2x2x1
jax: 0.10.0
libtpu: 0.0.40
codegen_flags: <defaults>
</compile_context>

<pallas_src>
import functools

import jax
import jax.numpy as jnp
from jax.experimental import pallas as pl
from jax.experimental.pallas import tpu as pltpu


def mlp_kernel(x_ref, w1_ref, b1_ref, w2_ref, b2_ref, w3_ref, b3_ref, o_ref,
               *, precision):
    # x arrives untransposed: (TB, in_f).  Contract W's feature axis (dim 1)
    # against x's feature axis (dim 1) so every result is (features, TB):
    # batch on the lane axis -> lane-dense math and a lane-dense output store.
    nt = (((1,), (1,)), ((), ()))                    # "A @ B^T" contraction
    x = x_ref[...]                                                   # (TB, in)
    h1 = jax.lax.dot_general(w1_ref[...], x, nt,
                             preferred_element_type=jnp.float32,
                             precision=precision)                    # (h1, TB)
    h1 = jnp.maximum(h1 + b1_ref[...], 0.0)                          # ReLU
    h2 = jnp.dot(w2_ref[...], h1,
                 preferred_element_type=jnp.float32,
                 precision=precision)                                # (h2, TB)
    h2 = jnp.maximum(h2 + b2_ref[...], 0.0)                          # ReLU
    y = jnp.dot(w3_ref[...], h2,
                preferred_element_type=jnp.float32,
                precision=precision)                                 # (out, TB)
    o_ref[...] = (y + b3_ref[...]).astype(o_ref.dtype)


def _round_up(n, m):
    return ((n + m - 1) // m) * m


def _num_tensorcores():
    # Heuristic: v7x has 2 TensorCores per chip; v5e/v6e have 1.
    try:
        kind = jax.devices()[0].device_kind.lower()
    except Exception:
        return 1
    return 2 if ("v7" in kind or "7x" in kind) else 1


def mlp_forward(x, params, *, tb_max=16384, precision=None):
    """x: (B, in_features) f32.  params: w (in, out), b (1, out) per layer."""
    w1, b1, w2, b2, w3, b3 = params
    B, in_f = x.shape
    h1_f, h2_f, out_f = w1.shape[1], w2.shape[1], w3.shape[1]

    # Batch tiling: pad only to a multiple of 128 (lane width), then split
    # into n_tiles tiles; keep an even #tiles >= #TensorCores on v7x.
    b128 = _round_up(B, 128)
    tb_cap = max(128, _round_up(min(tb_max, b128), 128))
    n_tiles = pl.cdiv(b128, tb_cap)
    num_tc = _num_tensorcores()
    if num_tc > 1 and b128 >= 128 * num_tc:
        n_tiles = _round_up(max(n_tiles, num_tc), num_tc)
    TB = _round_up(pl.cdiv(b128, n_tiles), 128)
    B_pad = TB * n_tiles

    # Natural layout; a single fused pad only when needed (no transpose, no
    # zeros + dynamic-update-slice, no round-up-to-TB waste).
    x_in = x if B_pad == B else jnp.pad(x, ((0, B_pad - B), (0, 0)))

    # Tiny (<1 KB) weights/biases: transpose once in the wrapper; they stay
    # VMEM-resident across all batch tiles (index_map -> block (0, 0)).
    w1t, w2t, w3t = w1.T, w2.T, w3.T          # (out, in)
    b1t, b2t, b3t = b1.T, b2.T, b3.T          # (out, 1)

    def resident(shape):
        return pl.BlockSpec(shape, lambda i: (0, 0))

    kernel = functools.partial(mlp_kernel, precision=precision)
    y_t = pl.pallas_call(
        kernel,
        out_shape=jax.ShapeDtypeStruct((out_f, B_pad), jnp.float32),
        grid=(n_tiles,),
        in_specs=[
            pl.BlockSpec((TB, in_f), lambda i: (i, 0)),   # x tile, natural layout
            resident((h1_f, in_f)), resident((h1_f, 1)),
            resident((h2_f, h1_f)), resident((h2_f, 1)),
            resident((out_f, h2_f)), resident((out_f, 1)),
        ],
        out_specs=pl.BlockSpec((out_f, TB), lambda i: (0, i)),   # lane-dense
        compiler_params=pltpu.CompilerParams(
            dimension_semantics=("parallel",),      # dual-TC sharding on v7x
            vmem_limit_bytes=32 * 1024 * 1024,      # lane-padded x blocks @ 16K rows
        ),
    )(x_in, w1t, b1t, w2t, b2t, w3t, b3t)

    return y_t[:, :B].T                             # (B, out_f); tiny copy


def init_params(key, in_features=11, h1=8, h2=9, out_features=1):
    # Deterministic init mimicking PyTorch nn.Linear (uniform +/- 1/sqrt(fan_in)).
    ks = jax.random.split(key, 6)

    def lin(kw, kb, fan_in, fan_out):
        bound = 1.0 / jnp.sqrt(fan_in)
        w = jax.random.uniform(kw, (fan_in, fan_out), jnp.float32, -bound, bound)
        b = jax.random.uniform(kb, (1, fan_out), jnp.float32, -bound, bound)
        return w, b

    w1, b1 = lin(ks[0], ks[1], in_features, h1)
    w2, b2 = lin(ks[2], ks[3], h1, h2)
    w3, b3 = lin(ks[4], ks[5], h2, out_features)
    return (w1, b1, w2, b2, w3, b3)


def reference_forward(x, params):
    w1, b1, w2, b2, w3, b3 = params
    hp = jax.lax.Precision.HIGHEST
    a1 = jnp.maximum(jnp.dot(x, w1, precision=hp) + b1, 0.0)
    a2 = jnp.maximum(jnp.dot(a1, w2, precision=hp) + b2, 0.0)
    return jnp.dot(a2, w3, precision=hp) + b3


if __name__ == "__main__":
    key = jax.random.PRNGKey(0)
    kx, kp, kx2 = jax.random.split(key, 3)
    in_features = 11
    params = init_params(kp)

    # Small single-tile check (batch 8 pads to one 128-row tile).
    batch = 8
    x = jax.random.normal(kx, (batch, in_features), dtype=jnp.float32)
    out = jax.block_until_ready(mlp_forward(x, params))
    ref = reference_forward(x, params)
    assert out.shape == (batch, 1), out.shape
    # Kernel uses DEFAULT MXU precision (bf16 pass, f32 accumulate) per perf
    # review -> loosened tolerance vs. the f32-HIGHEST reference.
    assert jnp.allclose(out, ref, atol=5e-2, rtol=5e-2), "mismatch vs reference"

    # Multi-tile check: non-multiple-of-128 batch + tiny tile cap exercises
    # the 128-padding policy, the grid, and the "parallel" batch axis.
    batch2 = 300
    x2 = jax.random.normal(kx2, (batch2, in_features), dtype=jnp.float32)
    out2 = jax.block_until_ready(mlp_forward(x2, params, tb_max=128))
    ref2 = reference_forward(x2, params)
    assert out2.shape == (batch2, 1), out2.shape
    assert jnp.allclose(out2, ref2, atol=5e-2, rtol=5e-2), "mismatch (tiled)"

    print("KERNEL_OK")
</pallas_src>

<mosaic_0001>
module attributes {stable_mosaic.version = 11 : i64} {
  func.func @mlp_kernel(%arg0: i32, %arg1: memref<128x11xf32, #tpu.memory_space<vmem>>, %arg2: memref<8x11xf32, #tpu.memory_space<vmem>>, %arg3: memref<8x1xf32, #tpu.memory_space<vmem>>, %arg4: memref<9x8xf32, #tpu.memory_space<vmem>>, %arg5: memref<9x1xf32, #tpu.memory_space<vmem>>, %arg6: memref<1x9xf32, #tpu.memory_space<vmem>>, %arg7: memref<1x1xf32, #tpu.memory_space<vmem>>, %arg8: memref<1x128xf32, #tpu.memory_space<vmem>>) attributes {dimension_semantics = [#tpu.dimension_semantics<parallel>], iteration_bounds = array<i64: 1>, scalar_prefetch = 0 : i64, scratch_operands = 0 : i64, tpu.core_type = #tpu.core_type<tc>, window_params = [{transform_indices = @transform_0, window_bounds = array<i64: 128, 11>}, {pipeline_mode = #tpu.pipeline_mode<synchronous>, transform_indices = @transform_1, window_bounds = array<i64: 8, 11>}, {pipeline_mode = #tpu.pipeline_mode<synchronous>, transform_indices = @transform_2, window_bounds = array<i64: 8, 1>}, {pipeline_mode = #tpu.pipeline_mode<synchronous>, transform_indices = @transform_3, window_bounds = array<i64: 9, 8>}, {pipeline_mode = #tpu.pipeline_mode<synchronous>, transform_indices = @transform_4, window_bounds = array<i64: 9, 1>}, {pipeline_mode = #tpu.pipeline_mode<synchronous>, transform_indices = @transform_5, window_bounds = array<i64: 1, 9>}, {pipeline_mode = #tpu.pipeline_mode<synchronous>, transform_indices = @transform_6, window_bounds = array<i64: 1, 1>}, {transform_indices = @transform_7, window_bounds = array<i64: 1, 128>}]} {
    %c0 = arith.constant 0 : index
    %c0_0 = arith.constant 0 : index
    %0 = vector.load %arg1[%c0, %c0_0] : memref<128x11xf32, #tpu.memory_space<vmem>>, vector<128x11xf32>
    %c0_1 = arith.constant 0 : index
    %c0_2 = arith.constant 0 : index
    %1 = vector.load %arg2[%c0_1, %c0_2] : memref<8x11xf32, #tpu.memory_space<vmem>>, vector<8x11xf32>
    %cst = arith.constant dense<0.000000e+00> : vector<8x128xf32>
    %2 = tpu.matmul %1, %0, %cst {dimension_numbers = #tpu.dot_dimension_numbers<[1], [1], [0], [0], [0, 0, 1, 0], [], []>} : vector<8x11xf32>, vector<128x11xf32>, vector<8x128xf32> -> vector<8x128xf32>
    %c0_3 = arith.constant 0 : index
    %c0_4 = arith.constant 0 : index
    %3 = vector.load %arg3[%c0_3, %c0_4] : memref<8x1xf32, #tpu.memory_space<vmem>>, vector<8x1xf32>
    %4 = vector.broadcast %3 : vector<8x1xf32> to vector<8x128xf32>
    %5 = arith.addf %2, %4 : vector<8x128xf32>
    %cst_5 = arith.constant 0.000000e+00 : f32
    %6 = vector.broadcast %cst_5 : f32 to vector<8x128xf32>
    %7 = arith.maximumf %5, %6 : vector<8x128xf32>
    %c0_6 = arith.constant 0 : index
    %c0_7 = arith.constant 0 : index
    %8 = vector.load %arg4[%c0_6, %c0_7] : memref<9x8xf32, #tpu.memory_space<vmem>>, vector<9x8xf32>
    %cst_8 = arith.constant dense<0.000000e+00> : vector<9x128xf32>
    %9 = tpu.matmul %8, %7, %cst_8 {dimension_numbers = #tpu.dot_dimension_numbers<[1], [0], [0], [1], [0, 0, 1, 1], [], []>} : vector<9x8xf32>, vector<8x128xf32>, vector<9x128xf32> -> vector<9x128xf32>
    %c0_9 = arith.constant 0 : index
    %c0_10 = arith.constant 0 : index
    %10 = vector.load %arg5[%c0_9, %c0_10] : memref<9x1xf32, #tpu.memory_space<vmem>>, vector<9x1xf32>
    %11 = vector.broadcast %10 : vector<9x1xf32> to vector<9x128xf32>
    %12 = arith.addf %9, %11 : vector<9x128xf32>
    %cst_11 = arith.constant 0.000000e+00 : f32
    %13 = vector.broadcast %cst_11 : f32 to vector<9x128xf32>
    %14 = arith.maximumf %12, %13 : vector<9x128xf32>
    %c0_12 = arith.constant 0 : index
    %c0_13 = arith.constant 0 : index
    %15 = vector.load %arg6[%c0_12, %c0_13] : memref<1x9xf32, #tpu.memory_space<vmem>>, vector<1x9xf32>
    %cst_14 = arith.constant dense<0.000000e+00> : vector<1x128xf32>
    %16 = tpu.matmul %15, %14, %cst_14 {dimension_numbers = #tpu.dot_dimension_numbers<[1], [0], [0], [1], [0, 0, 1, 1], [], []>} : vector<1x9xf32>, vector<9x128xf32>, vector<1x128xf32> -> vector<1x128xf32>
    %c0_15 = arith.constant 0 : index
    %c0_16 = arith.constant 0 : index
    %17 = vector.load %arg7[%c0_15, %c0_16] : memref<1x1xf32, #tpu.memory_space<vmem>>, vector<1x1xf32>
    %18 = vector.broadcast %17 : vector<1x1xf32> to vector<1x128xf32>
    %19 = arith.addf %16, %18 : vector<1x128xf32>
    %c0_17 = arith.constant 0 : index
    %c0_18 = arith.constant 0 : index
    %20 = vector.load %arg8[%c0_17, %c0_18] : memref<1x128xf32, #tpu.memory_space<vmem>>, vector<1x128xf32>
    tpu.vector_store %arg8[%c0_17, %c0_18], %19 {strides = array<i32>} : memref<1x128xf32, #tpu.memory_space<vmem>>, vector<1x128xf32>,
    return
  }
  func.func @transform_0(%arg0: i32) -> (i32, i32) {
    %c0_i32 = arith.constant 0 : i32
    %c0_i32_0 = arith.constant 0 : i32
    return %arg0, %c0_i32 : i32, i32
  }
  func.func @transform_1(%arg0: i32) -> (i32, i32) {
    %c0_i32 = arith.constant 0 : i32
    %c0_i32_0 = arith.constant 0 : i32
    %c0_i32_1 = arith.constant 0 : i32
    return %c0_i32, %c0_i32_0 : i32, i32
  }
  func.func @transform_2(%arg0: i32) -> (i32, i32) {
    %c0_i32 = arith.constant 0 : i32
    %c0_i32_0 = arith.constant 0 : i32
    %c0_i32_1 = arith.constant 0 : i32
    return %c0_i32, %c0_i32_0 : i32, i32
  }
  func.func @transform_3(%arg0: i32) -> (i32, i32) {
    %c0_i32 = arith.constant 0 : i32
    %c0_i32_0 = arith.constant 0 : i32
    %c0_i32_1 = arith.constant 0 : i32
    return %c0_i32, %c0_i32_0 : i32, i32
  }
  func.func @transform_4(%arg0: i32) -> (i32, i32) {
    %c0_i32 = arith.constant 0 : i32
    %c0_i32_0 = arith.constant 0 : i32
    %c0_i32_1 = arith.constant 0 : i32
    return %c0_i32, %c0_i32_0 : i32, i32
  }
  func.func @transform_5(%arg0: i32) -> (i32, i32) {
    %c0_i32 = arith.constant 0 : i32
    %c0_i32_0 = arith.constant 0 : i32
    %c0_i32_1 = arith.constant 0 : i32
    return %c0_i32, %c0_i32_0 : i32, i32
  }
  func.func @transform_6(%arg0: i32) -> (i32, i32) {
    %c0_i32 = arith.constant 0 : i32
    %c0_i32_0 = arith.constant 0 : i32
    %c0_i32_1 = arith.constant 0 : i32
    return %c0_i32, %c0_i32_0 : i32, i32
  }
  func.func @transform_7(%arg0: i32) -> (i32, i32) {
    %c0_i32 = arith.constant 0 : i32
    %c0_i32_0 = arith.constant 0 : i32
    return %c0_i32, %arg0 : i32, i32
  }
}

</mosaic_0001>

<bundles_post_ra>
// kernel: tpu_custom_call.1
= control target key start
LH: loop header
LB: loop body
LE: loop exit
PB: predicated region body
PF: predicated region fallthrough
CT: control target
= control target key end

     0   :  { %s654_s0 = inlined_call_operand.vmem [shape: f32[128,11], index: 0, kind: input, shape index: {}]   ;;  %s655_s1 = inlined_call_operand.vmem [shape: f32[8,11], index: 1, kind: input, shape index: {}]   ;;  %s656_s2 = inlined_call_operand.vmem [shape: f32[8,1], index: 2, kind: input, shape index: {}]   ;;  %s657_s3 = inlined_call_operand.vmem [shape: f32[9,8], index: 3, kind: input, shape index: {}]   ;;  %s658_s4 = inlined_call_operand.vmem [shape: f32[9,1], index: 4, kind: input, shape index: {}]   ;;  %s659_s5 = inlined_call_operand.vmem [shape: f32[1,9], index: 5, kind: input, shape index: {}]   ;;  %s660_s6 = inlined_call_operand.<no memory space> [shape: f32[1,1], index: 6, kind: input, shape index: {}]   ;;  %s661_s7 = inlined_call_operand.hbm [shape: f32[1,128], index: 7, kind: output, shape index: {}]  }
   0x1   :  { %v12_v0 = vstv %s660_s6 }
   0x2   :  { %13 = vst [vmem:[#allocation2] sm:$0x1] %v12_v0 }
   0x3   :  { %v44_v1 = vld [vmem:[%s654_s0 + $0x78] sm:$0xff]  ;;  %vm52_vm0 = vcmask 89088   ;;  %v496_v2 = vmov 0.0   ;;  %vm497_vm1 = vmmov 0   ;;  %v498_v3 = vmov 0   ;;  %v43_v4 = vld [vmem:[%s654_s0 + $0x70] sm:$0xff] }
   0x4   :  { %421 = vmatprep.subr.mxu0 %v496_v2  ;;  %453 = vmatprep.mubr.msk.f32.mxu0 %vm497_vm1, %v496_v2  ;;  %v46_v5 = vld [vmem:[%s656_s2] sm:$0xff] }
   0x5   :  { %422 = vmatpush3.xpose.msk.msra.mxu0 %vm52_vm0, %v44_v1  ;;  %472 = vset.pattern.permute.xlu0 %v498_v3 }
   0x6   :  { %423 = vmatprep.subr.mxu0 %v496_v2  ;;  %473 = vset.pattern.permute.xlu1 %v498_v3 }
   0x7   :  { %49 = vperm.xlu0 %472, %v46_v5  }
   0x9   :  { %424 = vmatpush3.xpose.msk.msra.mxu0 %vm52_vm0, %v43_v4 }
   0xa   :  { %14 = vsyncpa [#allocation4], 0  ;;  %425 = vmatprep.subr.mxu0 %v496_v2  ;;  %v42_v6 = vld [vmem:[%s654_s0 + $0x68] sm:$0xff]  ;;  %v41_v8 = vld [vmem:[%s654_s0 + $0x60] sm:$0xff]  ;;  %vm189_vm2 = vcmask 64512   ;;  %vm288_vm3 = vcmask 1040384   ;;  %v280_v40 = vlaneseq }
   0xb   :  { %v178_v7 = vld [vmem:[%s658_s4 + $0x8] sm:$0x1]  ;;  %v40_v9 = vld [vmem:[%s654_s0 + $0x58] sm:$0xff]  ;;  %v39_v10 = vld [vmem:[%s654_s0 + $0x50] sm:$0xff]  ;;  %vm284_vm4 = vcmask 72704   ;;  %s499_s18 = smov [#allocation3]  }
   0xc   :  { %186 = vperm.xlu0 %472, %v178_v7   ;;  %v38_v11 = vld [vmem:[%s654_s0 + $0x48] sm:$0xff]  ;;  %v37_v12 = vld [vmem:[%s654_s0 + $0x40] sm:$0xff]  ;;  %v36_v13 = vld [vmem:[%s654_s0 + $0x38] sm:$0xff]  ;;  %v281_v41 = vshrl.u32 %v280_v40, 7  ;;  %s369_s19 = sshll.u32 %s499_s18, 4  ;;  %s370_s19 = int_to_ptr.vmem [resolvable:$true] %s369_s19 }
   0xd   :  { %426 = vmatpush3.xpose.msk.msra.mxu0 %vm52_vm0, %v42_v6  ;;  %v35_v14 = vld [vmem:[%s654_s0 + $0x30] sm:$0xff]  ;;  %v34_v15 = vld [vmem:[%s654_s0 + $0x28] sm:$0xff]  ;;  %v33_v16 = vld [vmem:[%s654_s0 + $0x20] sm:$0xff]  ;;  %s474_s20 = scalar_lea.vmem %s370_s19, 16  ;;  %p479_p1 = scmp.lt.s32.totalorder %s370_s19, %s370_s19 }
   0xe   :  { %427 = vmatprep.subr.mxu0 %v496_v2  ;;  %v32_v17 = vld [vmem:[%s654_s0 + $0x18] sm:$0xff]  ;;  %v31_v18 = vld [vmem:[%s654_s0 + $0x10] sm:$0xff]  ;;  %v30_v19 = vld [vmem:[%s654_s0 + $0x8] sm:$0xff]  ;;  %v282_v42 = vsub.s32 0, %v281_v41  ;;  %p475_p0 = scmp.ne.s32.totalorder %s370_s19, %s474_s20 }
   0xf   :  { %v29_v20 = vld [vmem:[%s654_s0] sm:$0xff]  ;;  %v176_v30 = vld [vmem:[%s657_s3 + $0x8] sm:$0x1] }
  0x10   :  { %v45_v21 = vld [vmem:[%s655_s1] sm:$0xff] }
  0x11   :  { %428 = vmatpush3.xpose.msk.msra.mxu0 %vm52_vm0, %v41_v8  ;;  %v175_v22 = vld [vmem:[%s657_s3] sm:$0xff] }
  0x12   :  { %429 = vmatprep.subr.mxu0 %v496_v2  ;;  %458 = vmatprep.mubr.msk.f32.mxu1 %vm189_vm2, %v175_v22  ;;  %v177_v23 = vld [vmem:[%s658_s4] sm:$0xff] }
  0x13   :  { %181 = vperm.xlu1 %473, %v177_v23   ;;  %v274_v24 = vld [vmem:[#allocation2] sm:$0x1] }
  0x14   :  { %v273_v39 = vld [vmem:[%s659_s5] sm:$0x1]  ;;  %s478_s5 = scalar_lea.vmem %s370_s19, 32 }
  0x15   :  { %430 = vmatpush3.xpose.msk.msra.mxu0 %vm52_vm0, %v40_v9  ;;  %p480_p2 = scmp.lt.s32.totalorder %s478_s5, %s474_s20 }
  0x16   :  { %431 = vmatprep.subr.mxu0 %v496_v2 }
  0x17   :  { %277 = vperm.xlu1 %473, %v274_v24   ;;  %p481_p3 = por %p480_p2, %p479_p1 }
  0x19   :  { %432 = vmatpush3.xpose.msk.msra.mxu0 %vm52_vm0, %v39_v10  ;;  %p482_p4 = pnand %p481_p3, %p475_p0 }
  0x1a   :  { %433 = vmatprep.subr.mxu0 %v496_v2 }
  0x1d   :  { %434 = vmatpush3.xpose.msk.msra.mxu0 %vm52_vm0, %v38_v11 }
  0x1e   :  { %435 = vmatprep.subr.mxu0 %v496_v2 }
  0x21   :  { %436 = vmatpush3.xpose.msk.msra.mxu0 %vm52_vm0, %v37_v12 }
  0x22   :  { %437 = vmatprep.subr.mxu0 %v496_v2 }
  0x25   :  { %438 = vmatpush3.xpose.msk.msra.mxu0 %vm52_vm0, %v36_v13 }
  0x26   :  { %439 = vmatprep.subr.mxu0 %v496_v2 }
  0x29   :  { %440 = vmatpush3.xpose.msk.msra.mxu0 %vm52_vm0, %v35_v14 }
  0x2a   :  { %441 = vmatprep.subr.mxu0 %v496_v2 }
  0x2d   :  { %442 = vmatpush3.xpose.msk.msra.mxu0 %vm52_vm0, %v34_v15 }
  0x2e   :  { %443 = vmatprep.subr.mxu0 %v496_v2 }
  0x31   :  { %444 = vmatpush3.xpose.msk.msra.mxu0 %vm52_vm0, %v33_v16 }
  0x32   :  { %445 = vmatprep.subr.mxu0 %v496_v2 }
  0x35   :  { %446 = vmatpush3.xpose.msk.msra.mxu0 %vm52_vm0, %v32_v17 }
  0x36   :  { %447 = vmatprep.subr.mxu0 %v496_v2 }
  0x39   :  { %448 = vmatpush3.xpose.msk.msra.mxu0 %vm52_vm0, %v31_v18 }
  0x3a   :  { %449 = vmatprep.subr.mxu0 %v496_v2 }
  0x3d   :  { %450 = vmatpush3.xpose.msk.msra.mxu0 %vm52_vm0, %v30_v19 }
  0x3e   :  { %451 = vmatprep.subr.mxu0 %v496_v2 }
  0x41   :  { %452 = vmatpush3.xpose.msk.msra.mxu0 %vm52_vm0, %v29_v20 }
  0x44   :  { %454 = vmatmul.mubr.msk.f32.vlgmr.msra.gmra.mxu0 %vm52_vm0, %v45_v21 }
  0x82   :  { %v50_v25 = vpop.permute.xlu0 %49 }
  0x87   :  { %v187_v31 = vpop.permute.xlu0 %186 }
  0x8e   :  { %v182_v34 = vpop.permute.xlu1 %181 }
  0x92   :  { %v278_v43 = vpop.permute.xlu1 %277 }
  0x93   :  { %v283_v44 = vrot.slane %v278_v43, %v282_v42 }
 0x104   :  { %v170_v26 = vpop.f32.mrf.mxu0 }
 0x105   :  { %v171_v27 = vadd.f32 %v170_v26, %v50_v25 }
 0x106   :  { %v455_v28 = vpop.f32.mrf.mxu0 }
 0x107   :  { %v174_v29 = vmax.f32 %v171_v27, 0.0 }
 0x109   :  { %456 = vmatprep.subr.mxu1 %v174_v29 }
 0x10a   :  { %457 = vmatpush3.msra.mxu1 %v174_v29 }
 0x10b   :  { %459 = vmatmul.mubr.msk.f32.vlgmr.msra.gmra.mxu1 %vm189_vm2, %v176_v30  ;;  %461 = vmatprep.subr.mxu1 %v496_v2 }
 0x10c   :  { %465 = vmatprep.mubr.msk.f32.mxu1 %vm497_vm1, %v496_v2 }
 0x1cb   :  { %v460_v32 = vpop.f32.mrf.mxu1 }
 0x1cc   :  { %v268_v33 = vadd.f32 %v460_v32, %v187_v31 }
 0x1cd   :  { %v262_v35 = vpop.f32.mrf.mxu1 }
 0x1ce   :  { %v272_v36 = vmax.f32 %v268_v33, 0.0  ;;  %v263_v37 = vadd.f32 %v262_v35, %v182_v34 }
 0x1d0   :  { %v271_v38 = vmax.f32 %v263_v37, 0.0  ;;  %462 = vmatpush3.msk.msra.mxu1 %vm288_vm3, %v272_v36 }
 0x1d1   :  { %463 = vmatprep.subr.mxu1 %v496_v2 }
 0x1d2   :  { %464 = vmatpush3.msra.mxu1 %v271_v38 }
 0x1d3   :  { %466 = vmatmul.mubr.msk.f32.vlgmr.msra.gmra.mxu1 %vm284_vm4, %v273_v39 }
 0x293   :  { %v358_v45 = vpop.f32.mrf.mxu1 }
 0x294   :  { %v359_v46 = vadd.f32 %v358_v45, %v283_v44 }
 0x295   :  { %v467_v47 = vpop.f32.mrf.mxu1 }
 0x296   :  { %362 = vst [vmem:[#allocation3] sm:$0x1] %v359_v46 }
 0x297   :  { %485 = shalt.err (!%p482_p4)
}
 0x298   :  { %372 = dma.vmem_to_hbm [thread:$0]  %s370_s19, 16, %s661_s7, [#allocation4]  }
 0x299   :  { %494 = dma.done.wait [#allocation4], 16  }
 0x29a   :  { %495 = vsyncadd [#allocation4], 4294967280 }
 0x29b   :  { %376 = vsyncpa [#allocation4], 1 }

</bundles_post_ra>
